<compile_context>
chip_gen: v7x
topology: tpu7x:2x2x1
jax: 0.10.0
libtpu: 0.0.40
codegen_flags: <defaults>
</compile_context>

<pallas_src>
import jax
import jax.numpy as jnp
from jax import lax
from jax.experimental import pallas as pl
from jax.experimental.pallas import tpu as pltpu


def _round_up(x, m):
    return ((x + m - 1) // m) * m


def _sp2_kernel(x_ref, o_ref, acc_ref):
    # x_ref:   (Bp, tk) tile of the flattened features for the current K-slice
    # o_ref:   (Bp, Bp) output Gram matrix (resident across the reduction axis)
    # acc_ref: (Bp, Bp) f32 accumulator scratch
    k = pl.program_id(0)

    @pl.when(k == 0)
    def _():
        acc_ref[...] = jnp.zeros_like(acc_ref)

    x = x_ref[...]
    # x @ x.T without materializing a transpose: contract last axis of both.
    acc_ref[...] += lax.dot_general(
        x, x,
        dimension_numbers=(((1,), (1,)), ((), ())),
        preferred_element_type=jnp.float32,
    )

    @pl.when(k == pl.num_programs(0) - 1)
    def _():
        o_ref[...] = acc_ref[...].astype(o_ref.dtype)


def sp2_forward(fm_s, *, max_tk=2048, input_vmem_budget=16 * 1024 * 1024):
    """fm_s: (B, C, H, W). Returns (B, B) Gram matrix, same semantics as SP2.forward."""
    B = fm_s.shape[0]
    x = fm_s.reshape(B, -1)          # same as torch .view(B, -1)
    D = x.shape[1]
    itemsize = jnp.dtype(x.dtype).itemsize

    # Pad batch to a sublane multiple (8). Zero rows only add zero rows/cols
    # to the Gram matrix; we slice the (B, B) corner at the end.
    Bp = max(8, _round_up(B, 8))

    # Reduction tile: largest multiple of 128 <= max_tk that keeps the
    # double-buffered (Bp, tk) input block within the VMEM budget, and no
    # larger than the (128-aligned) reduction extent.
    tk = max(128, (max_tk // 128) * 128)
    cap = input_vmem_budget // (2 * Bp * itemsize)
    tk = min(tk, max(128, (cap // 128) * 128))
    tk = min(tk, _round_up(D, 128))

    # Pad D with zeros to a multiple of tk (does not change X @ X.T).
    Dp = _round_up(D, tk)
    n_k = Dp // tk

    if (Bp, Dp) != (B, D):
        x = jnp.pad(x, ((0, Bp - B), (0, Dp - D)))

    out_dtype = x.dtype
    out_itemsize = jnp.dtype(out_dtype).itemsize

    # VMEM actually used: double-buffered input blocks + f32 accumulator +
    # double-buffered output block. Request it explicitly (v5e's default
    # scoped VMEM is only 16 MiB), capped well under v7x's 64 MiB physical.
    vmem_needed = (2 * Bp * tk * itemsize
                   + Bp * Bp * 4
                   + 2 * Bp * Bp * out_itemsize)
    vmem_limit = int(min(max(2 * vmem_needed + (4 << 20), 32 << 20), 48 << 20))

    cost = pl.CostEstimate(
        flops=2 * Bp * Bp * Dp,
        transcendentals=0,
        bytes_accessed=Bp * Dp * itemsize + Bp * Bp * out_itemsize,
    )

    gram = pl.pallas_call(
        _sp2_kernel,
        out_shape=jax.ShapeDtypeStruct((Bp, Bp), out_dtype),
        grid_spec=pltpu.PrefetchScalarGridSpec(
            num_scalar_prefetch=0,
            grid=(n_k,),
            in_specs=[pl.BlockSpec((Bp, tk), lambda k: (0, k))],
            out_specs=pl.BlockSpec((Bp, Bp), lambda k: (0, 0)),
            scratch_shapes=[pltpu.VMEM((Bp, Bp), jnp.float32)],
        ),
        compiler_params=pltpu.CompilerParams(
            dimension_semantics=("arbitrary",),
            vmem_limit_bytes=vmem_limit,
        ),
        cost_estimate=cost,
    )(x)

    return gram[:B, :B]


if __name__ == "__main__":
    key = jax.random.PRNGKey(0)
    # small shapes consistent with the module's forward: NCHW feature map
    B, C, H, W = 2, 4, 16, 16
    fm_s = jax.random.normal(key, (B, C, H, W), dtype=jnp.float32)

    G_s = sp2_forward(fm_s)
    G_s = jax.block_until_ready(G_s)

    # reference check in plain JAX
    x_flat = fm_s.reshape(B, -1)
    G_ref = x_flat @ x_flat.T
    assert G_s.shape == (B, B)
    assert jnp.allclose(G_s, G_ref, atol=1e-4, rtol=1e-4)

    print("KERNEL_OK")
</pallas_src>

<mosaic_0001>
module attributes {stable_mosaic.version = 11 : i64} {
  func.func @_sp2_kernel(%arg0: i32, %arg1: memref<8x1024xf32, #tpu.memory_space<vmem>>, %arg2: memref<8x8xf32, #tpu.memory_space<vmem>>, %arg3: memref<8x8xf32, #tpu.memory_space<vmem>>) attributes {dimension_semantics = [#tpu.dimension_semantics<arbitrary>], iteration_bounds = array<i64: 1>, scalar_prefetch = 0 : i64, scratch_operands = 1 : i64, tpu.core_type = #tpu.core_type<tc>, window_params = [{transform_indices = @transform_0, window_bounds = array<i64: 8, 1024>}, {pipeline_mode = #tpu.pipeline_mode<synchronous>, transform_indices = @transform_1, window_bounds = array<i64: 8, 8>}]} {
    %c0_i32 = arith.constant 0 : i32
    %0 = arith.cmpi eq, %arg0, %c0_i32 : i32
    %1 = arith.extui %0 : i1 to i32
    %c0_i32_0 = arith.constant 0 : i32
    %2 = arith.cmpi ne, %1, %c0_i32_0 : i32
    scf.if %2 {
      %cst_8 = arith.constant 0.000000e+00 : f32
      %11 = vector.broadcast %cst_8 : f32 to vector<8x8xf32>
      %c0_9 = arith.constant 0 : index
      %c0_10 = arith.constant 0 : index
      %12 = vector.load %arg3[%c0_9, %c0_10] : memref<8x8xf32, #tpu.memory_space<vmem>>, vector<8x8xf32>
      tpu.vector_store %arg3[%c0_9, %c0_10], %11 {strides = array<i32>} : memref<8x8xf32, #tpu.memory_space<vmem>>, vector<8x8xf32>,
    } else {
    }
    %c0 = arith.constant 0 : index
    %c0_1 = arith.constant 0 : index
    %3 = vector.load %arg1[%c0, %c0_1] : memref<8x1024xf32, #tpu.memory_space<vmem>>, vector<8x1024xf32>
    %c0_2 = arith.constant 0 : index
    %c0_3 = arith.constant 0 : index
    %4 = vector.load %arg3[%c0_2, %c0_3] : memref<8x8xf32, #tpu.memory_space<vmem>>, vector<8x8xf32>
    %cst = arith.constant dense<0.000000e+00> : vector<8x8xf32>
    %5 = tpu.matmul %3, %3, %cst {dimension_numbers = #tpu.dot_dimension_numbers<[1], [1], [0], [0], [0, 0, 1, 0], [], []>} : vector<8x1024xf32>, vector<8x1024xf32>, vector<8x8xf32> -> vector<8x8xf32>
    %6 = arith.addf %4, %5 : vector<8x8xf32>
    %c0_4 = arith.constant 0 : index
    %c0_5 = arith.constant 0 : index
    %7 = vector.load %arg3[%c0_4, %c0_5] : memref<8x8xf32, #tpu.memory_space<vmem>>, vector<8x8xf32>
    tpu.vector_store %arg3[%c0_4, %c0_5], %6 {strides = array<i32>} : memref<8x8xf32, #tpu.memory_space<vmem>>, vector<8x8xf32>,
    %c0_i32_6 = arith.constant 0 : i32
    %8 = arith.cmpi eq, %arg0, %c0_i32_6 : i32
    %9 = arith.extui %8 : i1 to i32
    %c0_i32_7 = arith.constant 0 : i32
    %10 = arith.cmpi ne, %9, %c0_i32_7 : i32
    scf.if %10 {
      %c0_8 = arith.constant 0 : index
      %c0_9 = arith.constant 0 : index
      %11 = vector.load %arg3[%c0_8, %c0_9] : memref<8x8xf32, #tpu.memory_space<vmem>>, vector<8x8xf32>
      %c0_10 = arith.constant 0 : index
      %c0_11 = arith.constant 0 : index
      %12 = vector.load %arg2[%c0_10, %c0_11] : memref<8x8xf32, #tpu.memory_space<vmem>>, vector<8x8xf32>
      tpu.vector_store %arg2[%c0_10, %c0_11], %11 {strides = array<i32>} : memref<8x8xf32, #tpu.memory_space<vmem>>, vector<8x8xf32>,
    } else {
    }
    return
  }
  func.func @transform_0(%arg0: i32) -> (i32, i32) {
    %c0_i32 = arith.constant 0 : i32
    %c0_i32_0 = arith.constant 0 : i32
    return %c0_i32, %arg0 : i32, i32
  }
  func.func @transform_1(%arg0: i32) -> (i32, i32) {
    %c0_i32 = arith.constant 0 : i32
    %c0_i32_0 = arith.constant 0 : i32
    %c0_i32_1 = arith.constant 0 : i32
    return %c0_i32, %c0_i32_0 : i32, i32
  }
}

</mosaic_0001>

<bundles_post_ra>
// kernel: tpu_custom_call.1
= control target key start
LH: loop header
LB: loop body
LE: loop exit
PB: predicated region body
PF: predicated region fallthrough
CT: control target
= control target key end

     0   :  { %6 = vsyncpa [#allocation4], 0  ;;  %s430_s0 = inlined_call_operand.hbm [shape: f32[8,1024], index: 0, kind: input, shape index: {}]   ;;  %s431_s1 = inlined_call_operand.hbm [shape: f32[8,8], index: 1, kind: output, shape index: {}]  }
   0x1   :  { %7 = vsyncpa [#allocation5], 0  ;;  %s390_s6 = smov [#allocation3]   ;;  %s342_s10 = scalar_lea.hbm %s430_s0, 1024 }
   0x2   :  { %s14_s7 = sshll.u32 %s390_s6, 4  ;;  %p343_p0 = scmp.ne.s32.totalorder %s430_s0, %s342_s10  ;;  %s15_s7 = int_to_ptr.vmem [resolvable:$true] %s14_s7 }
   0x3   :  { %p346_p1 = scmp.lt.u32.totalorder %s342_s10, %s430_s0 }
   0x5   :  { %p348_p2 = pnand %p346_p1, %p343_p0 }
   0x7   :  { %351 = shalt.err (!%p348_p2)
}
   0x8   :  { %s352_s15 = scalar_lea.vmem %s15_s7, 1024  ;;  %p357_p4 = scmp.lt.s32.totalorder %s15_s7, %s15_s7 }
   0x9   :  { %p353_p3 = scmp.ne.s32.totalorder %s15_s7, %s352_s15  ;;  %p358_p5 = scmp.lt.s32.totalorder %s352_s15, %s352_s15 }
   0xb   :  { %p359_p6 = por %p358_p5, %p357_p4 }
   0xd   :  { %p360_p7 = pnand %p359_p6, %p353_p3 }
   0xf   :  { %363 = shalt.err (!%p360_p7)
}
  0x10   :  { %17 = dma.hbm_to_vmem [thread:$0]  %s430_s0, 1024, %s15_s7, [#allocation4]  }
  0x11   :  { %386 = dma.done.wait [#allocation4], 1024  }
  0x12   :  { %387 = vsyncadd [#allocation4], 4294966272  ;;  %v28_v0 = vld [vmem:[#allocation3 + $0x8] sm:$0xff]  ;;  %v27_v1 = vld [vmem:[#allocation3] sm:$0xff]  ;;  %vm25_vm0 = vcmask 64512   ;;  %v391_v8 = vmov 0.0  }
  0x13   :  { %v30_v2 = vld [vmem:[#allocation3 + $0x18] sm:$0xff]  ;;  %36 = vmatprep.subr.mxu0 %v28_v0  ;;  %v29_v3 = vld [vmem:[#allocation3 + $0x10] sm:$0xff]  ;;  %v32_v4 = vld [vmem:[#allocation3 + $0x28] sm:$0xff]  ;;  %100 = vmatprep.mubr.f32.mxu0 %v28_v0  ;;  %26 = vst.msk [vmem:[#allocation2] sm:$0xff] %vm25_vm0, %v391_v8  ;;  %s392_s0 = smov [#allocation6]  }
  0x14   :  { %106 = vmatprep.subr.mxu1 %v30_v2  ;;  %37 = vmatpush1.xpose.msra.mxu0 %v27_v1  ;;  %v34_v5 = vld [vmem:[#allocation3 + $0x38] sm:$0xff]  ;;  %v31_v6 = vld [vmem:[#allocation3 + $0x20] sm:$0xff]  ;;  %v33_v7 = vld [vmem:[#allocation3 + $0x30] sm:$0xff]  ;;  %s330_s18 = sshll.u32 %s392_s0, 4  ;;  %s331_s18 = int_to_ptr.vmem [resolvable:$true] %s330_s18 }
  0x15   :  { %107 = vmatpush1.xpose.msra.mxu1 %v29_v3  ;;  %170 = vmatprep.mubr.f32.mxu1 %v30_v2  ;;  %s364_s19 = scalar_lea.vmem %s331_s18, 128  ;;  %p369_p9 = scmp.lt.s32.totalorder %s331_s18, %s331_s18 }
  0x16   :  { %176 = vmatprep.subr.mxu0 %v32_v4  ;;  %246 = vmatprep.subr.mxu1 %v34_v5  ;;  %p365_p8 = scmp.ne.s32.totalorder %s331_s18, %s364_s19  ;;  %p370_p10 = scmp.lt.s32.totalorder %s364_s19, %s364_s19 }
  0x17   :  { %101 = vmatmul.mubr.f32.vlgmr.msra.gmra.mrb[0].mxu0 %v27_v1 }
  0x18   :  { %171 = vmatmul.mubr.f32.vlgmr.msra.gmra.mrb[0].mxu1 %v29_v3  ;;  %177 = vmatpush1.xpose.msra.mxu0 %v31_v6  ;;  %p371_p11 = por %p370_p10, %p369_p9 }
  0x19   :  { %240 = vmatprep.mubr.f32.mxu0 %v32_v4  ;;  %247 = vmatpush1.xpose.msra.mxu1 %v33_v7 }
  0x1a   :  { %310 = vmatprep.mubr.f32.mxu1 %v34_v5  ;;  %v35_v18 = vld [vmem:[#allocation2] sm:$0xff]  ;;  %p372_p12 = pnand %p371_p11, %p365_p8 }
  0x1b   :  { %241 = vmatmul.mubr.f32.vlgmr.msra.gmra.mrb[2].mxu0 %v31_v6 }
  0x1c   :  { %311 = vmatmul.mubr.f32.vlgmr.msra.gmra.mrb[2].mxu1 %v33_v7 }
  0xea   :  { %v102_v9 = vpop.f32.mrb[0].mxu0 }
  0xeb   :  { %v172_v10 = vpop.f32.mrb[0].mxu1  ;;  %v104_v11 = vpop.f32.mrb[1].mxu0 }
  0xec   :  { %v173_v12 = vadd.f32 %v172_v10, %v102_v9  ;;  %v174_v13 = vpop.f32.mrb[1].mxu1 }
  0xee   :  { %v242_v14 = vpop.f32.mrb[2].mxu0 }
  0xef   :  { %v243_v15 = vadd.f32 %v242_v14, %v173_v12  ;;  %v244_v16 = vpop.f32.mrb[3].mxu0  ;;  %v312_v17 = vpop.f32.mrb[2].mxu1 }
  0xf0   :  { %v314_v19 = vpop.f32.mrb[3].mxu1 }
  0xf1   :  { %v313_v20 = vadd.f32 %v312_v17, %v243_v15 }
  0xf3   :  { %v316_v21 = vadd.f32 %v313_v20, %v35_v18 }
  0xf5   :  { %318 = vst.msk [vmem:[#allocation2] sm:$0xff] %vm25_vm0, %v316_v21 }
  0xfc   :  { %v322_v22 = vld [vmem:[#allocation2] sm:$0xff] }
  0xfd   :  { %323 = vst.msk [vmem:[#allocation6] sm:$0xff] %vm25_vm0, %v322_v22 }
  0xfe   :  { %375 = shalt.err (!%p372_p12)
}
  0xff   :  { %s376_s22 = scalar_lea.hbm %s431_s1, 128 }
 0x100   :  { %p377_p13 = scmp.ne.s32.totalorder %s431_s1, %s376_s22  ;;  %p380_p0 = scmp.lt.u32.totalorder %s376_s22, %s431_s1 }
 0x102   :  { %p382_p1 = pnand %p380_p0, %p377_p13 }
 0x104   :  { %385 = shalt.err (!%p382_p1)
}
 0x105   :  { %333 = dma.vmem_to_hbm [thread:$0]  %s331_s18, 128, %s431_s1, [#allocation5]  }
 0x106   :  { %388 = dma.done.wait [#allocation5], 128  }
 0x107   :  { %389 = vsyncadd [#allocation5], 4294967168 }
 0x108   :  { %337 = vsyncpa [#allocation4], 1 }
 0x109   :  { %338 = vsyncpa [#allocation5], 1 }

</bundles_post_ra>
